<compile_context>
chip_gen: v7x
topology: tpu7x:2x2x1
jax: 0.10.0
libtpu: 0.0.40
codegen_flags: <defaults>
</compile_context>

<pallas_src>
import jax
import jax.numpy as jnp
from jax.experimental import pallas as pl
from jax.experimental.pallas import tpu as pltpu


def _round_up(x, m):
    return ((x + m - 1) // m) * m


def _make_fused_mlp_kernel(num_layers, compute_dtype):
    """Kernel body: refs = (x, w0, b0, w1, b1, ..., o)."""

    def kernel(*refs):
        x_ref = refs[0]
        o_ref = refs[1 + 2 * num_layers]
        act = x_ref[...]                              # (tile, in_f), input dtype
        # NOTE: for deep stacks this unroll could stage activations through one
        # (tile, max_width) VMEM scratch to bound live ranges; with the typical
        # 1-3 layer configs of InputEdgeModel the unroll is fine.
        for l in range(num_layers):                   # unrolled at trace time
            w = refs[1 + 2 * l][...]                  # (k, m), already compute_dtype
            b = refs[2 + 2 * l][...]                  # (1, m), float32
            y = jnp.dot(act.astype(compute_dtype), w,
                        preferred_element_type=jnp.float32)
            act = jnp.maximum(y + b, 0.0)             # bias + ReLU in f32
        o_ref[...] = act.astype(o_ref.dtype)

    return kernel


def fused_mlp(x, params, *, tile_n=1024, compute_dtype=jnp.bfloat16,
              out_dtype=None):
    """relu(...relu(x @ w0 + b0)... @ wL + bL) fused in one pallas_call.

    x:      (N, in_f) edge features.
    params: list of (w_i (in_i, out_i), b_i (out_i,)).
    compute_dtype: MXU input dtype (accumulation is always f32).  bf16 is native
        on v5e/v6e/v7x MXUs and halves weight traffic; use jnp.float32 for exact.
    out_dtype: output dtype (defaults to x.dtype).
    """
    num_layers = len(params)
    if num_layers == 0:
        return x

    n, in_f = x.shape
    assert int(params[0][0].shape[0]) == in_f, "first-layer in_features mismatch"
    out_f = int(params[-1][0].shape[1])
    out_dtype = x.dtype if out_dtype is None else jnp.dtype(out_dtype)

    # ---- weight / bias prep (tiny vs. the x stream) --------------------------
    #  * cast weights to compute_dtype here (one-time) — never inside the kernel
    #  * pad hidden widths to 128 lanes (lane-dense intermediate matmuls); the
    #    zero-padded cols + zero bias lanes stay exactly 0 through every ReLU
    #  * the LAST layer keeps out_f so the HBM output is written unpadded
    prepared = []
    cur_in = in_f
    for idx, (w, b) in enumerate(params):
        k_dim, o_dim = int(w.shape[0]), int(w.shape[1])
        is_last = idx == num_layers - 1
        o_pad = o_dim if is_last else _round_up(o_dim, 128)
        w_p = (jnp.zeros((cur_in, o_pad), compute_dtype)
               .at[:k_dim, :o_dim].set(w.astype(compute_dtype)))
        b_p = (jnp.zeros((1, o_pad), jnp.float32)
               .at[0, :o_dim].set(b.astype(jnp.float32)))
        prepared.append((w_p, b_p))
        cur_in = o_pad

    # ---- row tile -------------------------------------------------------------
    # Granularity 16 keeps the second-minor block dim legal for both f32 (8) and
    # bf16 (16) packing.  Aim for >= 2 grid steps so v7x can use both TCs.
    tile_n = max(16, _round_up(tile_n, 16))
    tile = min(tile_n, max(16, _round_up(pl.cdiv(n, 2), 16)))

    # ---- VMEM budget ----------------------------------------------------------
    x_itm = jnp.dtype(x.dtype).itemsize
    o_itm = jnp.dtype(out_dtype).itemsize
    wb_bytes = sum(int(w.size) * w.dtype.itemsize + int(b.size) * b.dtype.itemsize
                   for w, b in prepared)
    max_w = max([in_f] + [int(w.shape[1]) for w, _ in prepared])

    def vmem_needed(t, wb_buffers):
        io = 2 * t * in_f * x_itm + 2 * t * out_f * o_itm   # double-buffered x / out
        act = 2 * t * max_w * 4                             # f32 activation working set
        return wb_buffers * wb_bytes + io + act + (2 << 20)

    try:
        phys_vmem = int(pltpu.get_tpu_info().vmem_capacity_bytes)
    except Exception:
        phys_vmem = 64 << 20                                # v7x per-TC (smallest)
    vmem_cap = min((phys_vmem * 3) // 4, 100 << 20)         # ~96MiB v5e/v6e, ~48MiB v7x

    while tile > 16 and vmem_needed(tile, 2) > vmem_cap:
        tile = max(16, _round_up(tile // 2, 16))
    vmem_limit = int(min(max(vmem_needed(tile, 2), 8 << 20), vmem_cap))
    # TODO(synk): if the resident weight stack alone exceeds vmem_cap (very large
    # fc_features/fc_layers), fall back to a K/N-tiled weight grid.

    num_tiles = pl.cdiv(n, tile)

    flops = sum(2 * n * int(w.shape[0]) * int(w.shape[1]) for w, _ in prepared)
    cost = pl.CostEstimate(
        flops=flops,
        transcendentals=0,
        bytes_accessed=int(n * in_f * x_itm + n * out_f * o_itm + wb_bytes))

    kernel = _make_fused_mlp_kernel(num_layers, compute_dtype)

    def call(single_buffer_weights):
        # Resident weights/biases: constant index_map -> fetched once.  With
        # pl.Buffered(1) we also skip the useless second VMEM buffer.
        wb_kw = {"pipeline_mode": pl.Buffered(1)} if single_buffer_weights else {}
        in_specs = [pl.BlockSpec((tile, in_f), lambda i: (i, 0))]
        flat = []
        for w_p, b_p in prepared:
            in_specs.append(pl.BlockSpec(w_p.shape, lambda i: (0, 0), **wb_kw))
            in_specs.append(pl.BlockSpec(b_p.shape, lambda i: (0, 0), **wb_kw))
            flat.extend([w_p, b_p])
        out_specs = pl.BlockSpec((tile, out_f), lambda i: (i, 0))
        return pl.pallas_call(
            kernel,
            out_shape=jax.ShapeDtypeStruct((n, out_f), out_dtype),
            grid=(num_tiles,),
            in_specs=in_specs,
            out_specs=out_specs,
            compiler_params=pltpu.CompilerParams(
                dimension_semantics=("parallel",),   # row grid shards across TCs (v7x)
                vmem_limit_bytes=vmem_limit,
            ),
            cost_estimate=cost,
        )(x, *flat)

    try:
        return call(True)
    except Exception:
        # Some Pallas versions reject pipeline_mode=pl.Buffered(1); plain
        # (double-buffered but never re-fetched) resident blocks are the fallback.
        return call(False)


class InputEdgeModelPallas:
    """JAX/Pallas port of xib InputEdgeModel (Sequential of Linear -> ReLU)."""

    def __init__(self, in_linear_features=None, fc_features=None, fc_layers=0,
                 *, key=None, dtype=jnp.float32):
        if in_linear_features is None:
            in_linear_features = 0
        if key is None:
            key = jax.random.PRNGKey(0)

        self.params = []
        in_features = in_linear_features
        for _ in range(fc_layers):
            key, kw, kb = jax.random.split(key, 3)
            # Mimics nn.Linear's uniform(-1/sqrt(fan_in), 1/sqrt(fan_in)) init.
            bound = 1.0 / (in_features ** 0.5) if in_features > 0 else 0.0
            w = jax.random.uniform(kw, (in_features, fc_features),
                                   minval=-bound, maxval=bound, dtype=dtype)
            b = jax.random.uniform(kb, (fc_features,),
                                   minval=-bound, maxval=bound, dtype=dtype)
            self.params.append((w, b))
            in_features = fc_features
        self.out_features = in_features

    def __call__(self, linear_features, *, tile_n=1024,
                 compute_dtype=jnp.bfloat16, out_dtype=None):
        if not self.params:
            # fc_layers == 0 -> identity, matching the empty nn.Sequential.
            return linear_features
        return fused_mlp(linear_features, self.params, tile_n=tile_n,
                         compute_dtype=compute_dtype, out_dtype=out_dtype)


def _reference_forward(x, params):
    """Pure-JAX reference for correctness checking."""
    out = x
    for w, b in params:
        out = jnp.maximum(out @ w + b, 0.0)
    return out


if __name__ == "__main__":
    key = jax.random.PRNGKey(0)
    k_in, k_model = jax.random.split(key)

    # Small shapes consistent with the module: N edges x in_linear_features.
    N, IN_F, FC_F, FC_LAYERS = 16, 32, 64, 2
    x = jax.random.normal(k_in, (N, IN_F), dtype=jnp.float32)

    model = InputEdgeModelPallas(in_linear_features=IN_F, fc_features=FC_F,
                                 fc_layers=FC_LAYERS, key=k_model)
    ref = _reference_forward(x, model.params)

    # Default path: bf16 MXU inputs, f32 accumulate (loose tolerance).
    out = jax.block_until_ready(model(x))
    assert out.shape == (N, model.out_features)
    assert out.dtype == x.dtype
    assert jnp.allclose(out, ref, atol=5e-2, rtol=5e-2), "bf16 path mismatch"

    # Exact f32 MXU path.
    out_f32 = jax.block_until_ready(model(x, compute_dtype=jnp.float32))
    assert jnp.allclose(out_f32, ref, atol=1e-5, rtol=1e-5), "f32 path mismatch"

    # bf16 output path (halves HBM writeback for downstream bf16 consumers).
    out_b = jax.block_until_ready(model(x, out_dtype=jnp.bfloat16))
    assert out_b.dtype == jnp.bfloat16
    assert jnp.allclose(out_b.astype(jnp.float32), ref, atol=1e-1, rtol=1e-1)

    # Edge count that is not a multiple of the tile exercises the implicit
    # partial-last-block (masked output write) path.
    x_odd = jax.random.normal(k_in, (N + 3, IN_F), dtype=jnp.float32)
    out_odd = jax.block_until_ready(model(x_odd, compute_dtype=jnp.float32))
    ref_odd = _reference_forward(x_odd, model.params)
    assert jnp.allclose(out_odd, ref_odd, atol=1e-5, rtol=1e-5), "tail mismatch"

    # fc_layers == 0 -> identity (empty nn.Sequential).
    ident = InputEdgeModelPallas(in_linear_features=IN_F, fc_layers=0)
    assert jnp.allclose(ident(x), x)

    print("KERNEL_OK")
</pallas_src>

<mosaic_0001>
module attributes {stable_mosaic.version = 11 : i64} {
  func.func @kernel(%arg0: i32, %arg1: memref<16x32xf32, #tpu.memory_space<vmem>>, %arg2: memref<32x128xbf16, #tpu.memory_space<vmem>>, %arg3: memref<1x128xf32, #tpu.memory_space<vmem>>, %arg4: memref<128x64xbf16, #tpu.memory_space<vmem>>, %arg5: memref<1x64xf32, #tpu.memory_space<vmem>>, %arg6: memref<16x64xf32, #tpu.memory_space<vmem>>) attributes {dimension_semantics = [#tpu.dimension_semantics<parallel>], iteration_bounds = array<i64: 1>, scalar_prefetch = 0 : i64, scratch_operands = 0 : i64, tpu.core_type = #tpu.core_type<tc>, window_params = [{transform_indices = @transform_0, window_bounds = array<i64: 16, 32>}, {pipeline_mode = #tpu.pipeline_mode<synchronous>, transform_indices = @transform_1, window_bounds = array<i64: 32, 128>}, {pipeline_mode = #tpu.pipeline_mode<synchronous>, transform_indices = @transform_2, window_bounds = array<i64: 1, 128>}, {pipeline_mode = #tpu.pipeline_mode<synchronous>, transform_indices = @transform_3, window_bounds = array<i64: 128, 64>}, {pipeline_mode = #tpu.pipeline_mode<synchronous>, transform_indices = @transform_4, window_bounds = array<i64: 1, 64>}, {transform_indices = @transform_5, window_bounds = array<i64: 16, 64>}]} {
    %c0 = arith.constant 0 : index
    %c0_0 = arith.constant 0 : index
    %0 = vector.load %arg1[%c0, %c0_0] : memref<16x32xf32, #tpu.memory_space<vmem>>, vector<16x32xf32>
    %c0_1 = arith.constant 0 : index
    %c0_2 = arith.constant 0 : index
    %1 = vector.load %arg2[%c0_1, %c0_2] : memref<32x128xbf16, #tpu.memory_space<vmem>>, vector<32x128xbf16>
    %c0_3 = arith.constant 0 : index
    %c0_4 = arith.constant 0 : index
    %2 = vector.load %arg3[%c0_3, %c0_4] : memref<1x128xf32, #tpu.memory_space<vmem>>, vector<1x128xf32>
    %3 = arith.truncf %0 : vector<16x32xf32> to vector<16x32xbf16>
    %cst = arith.constant dense<0.000000e+00> : vector<16x128xf32>
    %4 = tpu.matmul %3, %1, %cst {dimension_numbers = #tpu.dot_dimension_numbers<[1], [0], [0], [1], [0, 0, 1, 1], [], []>} : vector<16x32xbf16>, vector<32x128xbf16>, vector<16x128xf32> -> vector<16x128xf32>
    %5 = vector.broadcast %2 : vector<1x128xf32> to vector<16x128xf32>
    %6 = arith.addf %4, %5 : vector<16x128xf32>
    %cst_5 = arith.constant 0.000000e+00 : f32
    %7 = vector.broadcast %cst_5 : f32 to vector<16x128xf32>
    %8 = arith.maximumf %6, %7 : vector<16x128xf32>
    %c0_6 = arith.constant 0 : index
    %c0_7 = arith.constant 0 : index
    %9 = vector.load %arg4[%c0_6, %c0_7] : memref<128x64xbf16, #tpu.memory_space<vmem>>, vector<128x64xbf16>
    %c0_8 = arith.constant 0 : index
    %c0_9 = arith.constant 0 : index
    %10 = vector.load %arg5[%c0_8, %c0_9] : memref<1x64xf32, #tpu.memory_space<vmem>>, vector<1x64xf32>
    %11 = arith.truncf %8 : vector<16x128xf32> to vector<16x128xbf16>
    %cst_10 = arith.constant dense<0.000000e+00> : vector<16x64xf32>
    %12 = tpu.matmul %11, %9, %cst_10 {dimension_numbers = #tpu.dot_dimension_numbers<[1], [0], [0], [1], [0, 0, 1, 1], [], []>} : vector<16x128xbf16>, vector<128x64xbf16>, vector<16x64xf32> -> vector<16x64xf32>
    %13 = vector.broadcast %10 : vector<1x64xf32> to vector<16x64xf32>
    %14 = arith.addf %12, %13 : vector<16x64xf32>
    %cst_11 = arith.constant 0.000000e+00 : f32
    %15 = vector.broadcast %cst_11 : f32 to vector<16x64xf32>
    %16 = arith.maximumf %14, %15 : vector<16x64xf32>
    %c0_12 = arith.constant 0 : index
    %c0_13 = arith.constant 0 : index
    %17 = vector.load %arg6[%c0_12, %c0_13] : memref<16x64xf32, #tpu.memory_space<vmem>>, vector<16x64xf32>
    tpu.vector_store %arg6[%c0_12, %c0_13], %16 {strides = array<i32>} : memref<16x64xf32, #tpu.memory_space<vmem>>, vector<16x64xf32>,
    return
  }
  func.func @transform_0(%arg0: i32) -> (i32, i32) {
    %c0_i32 = arith.constant 0 : i32
    %c0_i32_0 = arith.constant 0 : i32
    return %arg0, %c0_i32 : i32, i32
  }
  func.func @transform_1(%arg0: i32) -> (i32, i32) {
    %c0_i32 = arith.constant 0 : i32
    %c0_i32_0 = arith.constant 0 : i32
    %c0_i32_1 = arith.constant 0 : i32
    return %c0_i32, %c0_i32_0 : i32, i32
  }
  func.func @transform_2(%arg0: i32) -> (i32, i32) {
    %c0_i32 = arith.constant 0 : i32
    %c0_i32_0 = arith.constant 0 : i32
    %c0_i32_1 = arith.constant 0 : i32
    return %c0_i32, %c0_i32_0 : i32, i32
  }
  func.func @transform_3(%arg0: i32) -> (i32, i32) {
    %c0_i32 = arith.constant 0 : i32
    %c0_i32_0 = arith.constant 0 : i32
    %c0_i32_1 = arith.constant 0 : i32
    return %c0_i32, %c0_i32_0 : i32, i32
  }
  func.func @transform_4(%arg0: i32) -> (i32, i32) {
    %c0_i32 = arith.constant 0 : i32
    %c0_i32_0 = arith.constant 0 : i32
    %c0_i32_1 = arith.constant 0 : i32
    return %c0_i32, %c0_i32_0 : i32, i32
  }
  func.func @transform_5(%arg0: i32) -> (i32, i32) {
    %c0_i32 = arith.constant 0 : i32
    %c0_i32_0 = arith.constant 0 : i32
    return %arg0, %c0_i32 : i32, i32
  }
}

module attributes {stable_mosaic.version = 11 : i64} {
  func.func @kernel(%arg0: i32, %arg1: memref<16x32xf32, #tpu.memory_space<vmem>>, %arg2: memref<32x128xbf16, #tpu.memory_space<vmem>>, %arg3: memref<1x128xf32, #tpu.memory_space<vmem>>, %arg4: memref<128x64xbf16, #tpu.memory_space<vmem>>, %arg5: memref<1x64xf32, #tpu.memory_space<vmem>>, %arg6: memref<16x64xf32, #tpu.memory_space<vmem>>) attributes {dimension_semantics = [#tpu.dimension_semantics<parallel>], iteration_bounds = array<i64: 1>, scalar_prefetch = 0 : i64, scratch_operands = 0 : i64, tpu.core_type = #tpu.core_type<tc>, window_params = [{transform_indices = @transform_0, window_bounds = array<i64: 16, 32>}, {pipeline_mode = #tpu.pipeline_mode<synchronous>, transform_indices = @transform_1, window_bounds = array<i64: 32, 128>}, {pipeline_mode = #tpu.pipeline_mode<synchronous>, transform_indices = @transform_2, window_bounds = array<i64: 1, 128>}, {pipeline_mode = #tpu.pipeline_mode<synchronous>, transform_indices = @transform_3, window_bounds = array<i64: 128, 64>}, {pipeline_mode = #tpu.pipeline_mode<synchronous>, transform_indices = @transform_4, window_bounds = array<i64: 1, 64>}, {transform_indices = @transform_5, window_bounds = array<i64: 16, 64>}]} {
    %c0 = arith.constant 0 : index
    %c0_0 = arith.constant 0 : index
    %0 = vector.load %arg1[%c0, %c0_0] : memref<16x32xf32, #tpu.memory_space<vmem>>, vector<16x32xf32>
    %c0_1 = arith.constant 0 : index
    %c0_2 = arith.constant 0 : index
    %1 = vector.load %arg2[%c0_1, %c0_2] : memref<32x128xbf16, #tpu.memory_space<vmem>>, vector<32x128xbf16>
    %c0_3 = arith.constant 0 : index
    %c0_4 = arith.constant 0 : index
    %2 = vector.load %arg3[%c0_3, %c0_4] : memref<1x128xf32, #tpu.memory_space<vmem>>, vector<1x128xf32>
    %3 = arith.truncf %0 : vector<16x32xf32> to vector<16x32xbf16>
    %cst = arith.constant dense<0.000000e+00> : vector<16x128xf32>
    %4 = tpu.matmul %3, %1, %cst {dimension_numbers = #tpu.dot_dimension_numbers<[1], [0], [0], [1], [0, 0, 1, 1], [], []>} : vector<16x32xbf16>, vector<32x128xbf16>, vector<16x128xf32> -> vector<16x128xf32>
    %5 = vector.broadcast %2 : vector<1x128xf32> to vector<16x128xf32>
    %6 = arith.addf %4, %5 : vector<16x128xf32>
    %cst_5 = arith.constant 0.000000e+00 : f32
    %7 = vector.broadcast %cst_5 : f32 to vector<16x128xf32>
    %8 = arith.maximumf %6, %7 : vector<16x128xf32>
    %c0_6 = arith.constant 0 : index
    %c0_7 = arith.constant 0 : index
    %9 = vector.load %arg4[%c0_6, %c0_7] : memref<128x64xbf16, #tpu.memory_space<vmem>>, vector<128x64xbf16>
    %c0_8 = arith.constant 0 : index
    %c0_9 = arith.constant 0 : index
    %10 = vector.load %arg5[%c0_8, %c0_9] : memref<1x64xf32, #tpu.memory_space<vmem>>, vector<1x64xf32>
    %11 = arith.truncf %8 : vector<16x128xf32> to vector<16x128xbf16>
    %cst_10 = arith.constant dense<0.000000e+00> : vector<16x64xf32>
    %12 = tpu.matmul %11, %9, %cst_10 {dimension_numbers = #tpu.dot_dimension_numbers<[1], [0], [0], [1], [0, 0, 1, 1], [], []>} : vector<16x128xbf16>, vector<128x64xbf16>, vector<16x64xf32> -> vector<16x64xf32>
    %13 = vector.broadcast %10 : vector<1x64xf32> to vector<16x64xf32>
    %14 = arith.addf %12, %13 : vector<16x64xf32>
    %cst_11 = arith.constant 0.000000e+00 : f32
    %15 = vector.broadcast %cst_11 : f32 to vector<16x64xf32>
    %16 = arith.maximumf %14, %15 : vector<16x64xf32>
    %c0_12 = arith.constant 0 : index
    %c0_13 = arith.constant 0 : index
    %17 = vector.load %arg6[%c0_12, %c0_13] : memref<16x64xf32, #tpu.memory_space<vmem>>, vector<16x64xf32>
    tpu.vector_store %arg6[%c0_12, %c0_13], %16 {strides = array<i32>} : memref<16x64xf32, #tpu.memory_space<vmem>>, vector<16x64xf32>,
    return
  }
  func.func @transform_0(%arg0: i32) -> (i32, i32) {
    %c0_i32 = arith.constant 0 : i32
    %c0_i32_0 = arith.constant 0 : i32
    return %arg0, %c0_i32 : i32, i32
  }
  func.func @transform_1(%arg0: i32) -> (i32, i32) {
    %c0_i32 = arith.constant 0 : i32
    %c0_i32_0 = arith.constant 0 : i32
    %c0_i32_1 = arith.constant 0 : i32
    return %c0_i32, %c0_i32_0 : i32, i32
  }
  func.func @transform_2(%arg0: i32) -> (i32, i32) {
    %c0_i32 = arith.constant 0 : i32
    %c0_i32_0 = arith.constant 0 : i32
    %c0_i32_1 = arith.constant 0 : i32
    return %c0_i32, %c0_i32_0 : i32, i32
  }
  func.func @transform_3(%arg0: i32) -> (i32, i32) {
    %c0_i32 = arith.constant 0 : i32
    %c0_i32_0 = arith.constant 0 : i32
    %c0_i32_1 = arith.constant 0 : i32
    return %c0_i32, %c0_i32_0 : i32, i32
  }
  func.func @transform_4(%arg0: i32) -> (i32, i32) {
    %c0_i32 = arith.constant 0 : i32
    %c0_i32_0 = arith.constant 0 : i32
    %c0_i32_1 = arith.constant 0 : i32
    return %c0_i32, %c0_i32_0 : i32, i32
  }
  func.func @transform_5(%arg0: i32) -> (i32, i32) {
    %c0_i32 = arith.constant 0 : i32
    %c0_i32_0 = arith.constant 0 : i32
    return %arg0, %c0_i32 : i32, i32
  }
}

</mosaic_0001>

<bundles_post_ra>
// kernel: tpu_custom_call.1
= control target key start
LH: loop header
LB: loop body
LE: loop exit
PB: predicated region body
PF: predicated region fallthrough
CT: control target
= control target key end

     0   :  { %v321_v1 = vmov 0.0   ;;  %vm322_vm0 = vmmov 0   ;;  %vm48_vm1 = vcmask 261120   ;;  %s410_s0 = inlined_call_operand.vmem [shape: f32[16,32], index: 0, kind: input, shape index: {}]   ;;  %s411_s1 = inlined_call_operand.vmem [shape: bf16[32,128], index: 1, kind: input, shape index: {}]   ;;  %s412_s2 = inlined_call_operand.vmem [shape: f32[1,128], index: 2, kind: input, shape index: {}]   ;;  %s413_s3 = inlined_call_operand.vmem [shape: bf16[128,64], index: 3, kind: input, shape index: {}]   ;;  %s414_s4 = inlined_call_operand.vmem [shape: f32[1,64], index: 4, kind: input, shape index: {}]   ;;  %s415_s5 = inlined_call_operand.hbm [shape: f32[16,64], index: 5, kind: output, shape index: {}]  }
   0x1   :  { %v287_v0 = vld [vmem:[%s411_s1] sm:$0xff]   ;;  %254 = vmatprep.subr.bf16.mxu0 %v321_v1  ;;  %v288_v2 = vld [vmem:[%s411_s1 + $0x8] sm:$0xff]   ;;  %262 = vmatprep.subr.bf16.mxu1 %v321_v1  ;;  %v291_v8 = vld [vmem:[%s413_s3 + $0x10] sm:$0xff]  }
   0x2   :  { %255 = vmatpush3.bf16.msra.mxu0 %v287_v0  ;;  %258 = vmatprep.mubr.msk.bf16.mxu0 %vm322_vm0, %v321_v1  ;;  %v22_v3 = vld [vmem:[%s410_s0] sm:$0xff]  ;;  %v23_v4 = vld [vmem:[%s410_s0 + $0x8] sm:$0xff] }
   0x3   :  { %256 = vmatprep.subr.bf16.mxu0 %v321_v1  ;;  %v289_v5 = vld [vmem:[%s413_s3] sm:$0xff]   ;;  %278 = vmatprep.mubr.msk.bf16.mxu1 %vm322_vm0, %v321_v1  ;;  %v29_v6 = vpack.c.bf16 %v23_v4, %v22_v3  ;;  %v290_v7 = vld [vmem:[%s413_s3 + $0x8] sm:$0xff]  }
   0x4   :  { %263 = vmatpush3.bf16.msra.mxu1 %v289_v5 }
   0x5   :  { %264 = vmatprep.subr.bf16.mxu1 %v321_v1 }
   0x6   :  { %257 = vmatpush3.bf16.msra.mxu0 %v288_v2 }
   0x8   :  { %265 = vmatpush3.bf16.msra.mxu1 %v290_v7 }
   0x9   :  { %259 = vmatmul.mubr.msk.bf16.vlgmr.msra.gmra.mrb[0].mxu0 %vm48_vm1, %v29_v6  ;;  %266 = vmatprep.subr.bf16.mxu1 %v321_v1 }
   0xa   :  { %10 = vsyncpa [#allocation3], 0  ;;  %v292_v9 = vld [vmem:[%s413_s3 + $0x18] sm:$0xff]   ;;  %v293_v10 = vld [vmem:[%s413_s3 + $0x20] sm:$0xff]   ;;  %vm210_vm2 = vcmask 523264  }
   0xb   :  { %v294_v11 = vld [vmem:[%s413_s3 + $0x28] sm:$0xff]   ;;  %v295_v12 = vld [vmem:[%s413_s3 + $0x30] sm:$0xff]   ;;  %v296_v13 = vld [vmem:[%s413_s3 + $0x38] sm:$0xff]   ;;  %s323_s3 = smov [#allocation2]  }
   0xc   :  { %267 = vmatpush3.bf16.msra.mxu1 %v291_v8  ;;  %v229_v14 = vld [vmem:[%s412_s2] ss:$0 sm:$0xff]  ;;  %s218_s19 = sshll.u32 %s323_s3, 4  ;;  %s219_s19 = int_to_ptr.vmem [resolvable:$true] %s218_s19 }
   0xd   :  { %268 = vmatprep.subr.bf16.mxu1 %v321_v1  ;;  %v233_v24 = vld [vmem:[%s414_s4] ss:$0 sm:$0xff]  ;;  %s297_s2 = scalar_lea.vmem %s219_s19, 256  ;;  %p302_p1 = scmp.lt.s32.totalorder %s219_s19, %s219_s19 }
   0xe   :  { %p298_p0 = scmp.ne.s32.totalorder %s219_s19, %s297_s2  ;;  %p303_p2 = scmp.lt.s32.totalorder %s297_s2, %s297_s2 }
  0x10   :  { %269 = vmatpush3.bf16.msra.mxu1 %v292_v9  ;;  %p304_p3 = por %p303_p2, %p302_p1 }
  0x11   :  { %270 = vmatprep.subr.bf16.mxu1 %v321_v1 }
  0x12   :  { %p305_p4 = pnand %p304_p3, %p298_p0 }
  0x14   :  { %271 = vmatpush3.bf16.msra.mxu1 %v293_v10 }
  0x15   :  { %272 = vmatprep.subr.bf16.mxu1 %v321_v1 }
  0x18   :  { %273 = vmatpush3.bf16.msra.mxu1 %v294_v11 }
  0x19   :  { %274 = vmatprep.subr.bf16.mxu1 %v321_v1 }
  0x1c   :  { %275 = vmatpush3.bf16.msra.mxu1 %v295_v12 }
  0x1d   :  { %276 = vmatprep.subr.bf16.mxu1 %v321_v1 }
  0x20   :  { %277 = vmatpush3.bf16.msra.mxu1 %v296_v13 }
  0xdc   :  { %v86_v15 = vpop.f32.mrb[0].mxu0 }
  0xdd   :  { %v87_v16 = vadd.f32 %v229_v14, %v86_v15  ;;  %v260_v17 = vpop.f32.mrb[1].mxu0 }
  0xde   :  { %v89_v18 = vpop.f32.mrb[2].mxu0 }
  0xdf   :  { %v90_v19 = vadd.f32 %v229_v14, %v89_v18  ;;  %v261_v20 = vpop.f32.mrb[3].mxu0  ;;  %v93_v21 = vmax.f32 %v87_v16, 0.0 }
  0xe1   :  { %v94_v22 = vmax.f32 %v90_v19, 0.0 }
  0xe3   :  { %v112_v23 = vpack.c.bf16 %v94_v22, %v93_v21 }
  0xe5   :  { %279 = vmatmul.mubr.bf16.vlgmr.msra.gmra.mrb[0].mxu1 %v112_v23 }
 0x1b8   :  { %v201_v25 = vpop.f32.mrb[0].mxu1 }
 0x1b9   :  { %v202_v26 = vadd.f32 %v233_v24, %v201_v25  ;;  %v280_v27 = vpop.f32.mrb[1].mxu1 }
 0x1ba   :  { %v204_v28 = vpop.f32.mrb[2].mxu1 }
 0x1bb   :  { %v208_v29 = vmax.f32 %v202_v26, 0.0  ;;  %v205_v30 = vadd.f32 %v233_v24, %v204_v28  ;;  %v281_v31 = vpop.f32.mrb[3].mxu1 }
 0x1bd   :  { %211 = vst.msk [vmem:[#allocation2] sm:$0xff] %vm210_vm2, %v208_v29  ;;  %v209_v32 = vmax.f32 %v205_v30, 0.0 }
 0x1bf   :  { %212 = vst.msk [vmem:[#allocation2 + $0x8] sm:$0xff] %vm210_vm2, %v209_v32 }
 0x1c0   :  { %308 = shalt.err (!%p305_p4)
}
 0x1c1   :  { %s309_s21 = scalar_lea.hbm %s415_s5, 256 }
 0x1c2   :  { %p310_p5 = scmp.ne.s32.totalorder %s415_s5, %s309_s21  ;;  %p313_p6 = scmp.lt.u32.totalorder %s309_s21, %s415_s5 }
 0x1c4   :  { %p315_p7 = pnand %p313_p6, %p310_p5 }
 0x1c6   :  { %318 = shalt.err (!%p315_p7)
}
 0x1c7   :  { %s324_s26 = smov 128   ;;  %s325_s27 = smov 8  }
 0x1c8   :  { %224 = dma.vmem_to_hbm [thread:$0]  %s219_s19, 256, %s415_s5, [#allocation3], %s324_s26, %s324_s26, %s325_s27  }
 0x1c9   :  { %319 = dma.done.wait [#allocation3], 256  }
 0x1ca   :  { %320 = vsyncadd [#allocation3], 4294967040 }
 0x1cb   :  { %228 = vsyncpa [#allocation3], 1 }

// kernel: tpu_custom_call.1
= control target key start
LH: loop header
LB: loop body
LE: loop exit
PB: predicated region body
PF: predicated region fallthrough
CT: control target
= control target key end

     0   :  { %v321_v1 = vmov 0.0   ;;  %vm322_vm0 = vmmov 0   ;;  %vm48_vm1 = vcmask 261120   ;;  %s410_s0 = inlined_call_operand.vmem [shape: f32[16,32], index: 0, kind: input, shape index: {}]   ;;  %s411_s1 = inlined_call_operand.vmem [shape: bf16[32,128], index: 1, kind: input, shape index: {}]   ;;  %s412_s2 = inlined_call_operand.vmem [shape: f32[1,128], index: 2, kind: input, shape index: {}]   ;;  %s413_s3 = inlined_call_operand.vmem [shape: bf16[128,64], index: 3, kind: input, shape index: {}]   ;;  %s414_s4 = inlined_call_operand.vmem [shape: f32[1,64], index: 4, kind: input, shape index: {}]   ;;  %s415_s5 = inlined_call_operand.hbm [shape: f32[16,64], index: 5, kind: output, shape index: {}]  }
   0x1   :  { %v287_v0 = vld [vmem:[%s411_s1] sm:$0xff]   ;;  %254 = vmatprep.subr.bf16.mxu0 %v321_v1  ;;  %v288_v2 = vld [vmem:[%s411_s1 + $0x8] sm:$0xff]   ;;  %262 = vmatprep.subr.bf16.mxu1 %v321_v1  ;;  %v291_v8 = vld [vmem:[%s413_s3 + $0x10] sm:$0xff]  }
   0x2   :  { %255 = vmatpush3.bf16.msra.mxu0 %v287_v0  ;;  %258 = vmatprep.mubr.msk.bf16.mxu0 %vm322_vm0, %v321_v1  ;;  %v22_v3 = vld [vmem:[%s410_s0] sm:$0xff]  ;;  %v23_v4 = vld [vmem:[%s410_s0 + $0x8] sm:$0xff] }
   0x3   :  { %256 = vmatprep.subr.bf16.mxu0 %v321_v1  ;;  %v289_v5 = vld [vmem:[%s413_s3] sm:$0xff]   ;;  %278 = vmatprep.mubr.msk.bf16.mxu1 %vm322_vm0, %v321_v1  ;;  %v29_v6 = vpack.c.bf16 %v23_v4, %v22_v3  ;;  %v290_v7 = vld [vmem:[%s413_s3 + $0x8] sm:$0xff]  }
   0x4   :  { %263 = vmatpush3.bf16.msra.mxu1 %v289_v5 }
   0x5   :  { %264 = vmatprep.subr.bf16.mxu1 %v321_v1 }
   0x6   :  { %257 = vmatpush3.bf16.msra.mxu0 %v288_v2 }
   0x8   :  { %265 = vmatpush3.bf16.msra.mxu1 %v290_v7 }
   0x9   :  { %259 = vmatmul.mubr.msk.bf16.vlgmr.msra.gmra.mrb[0].mxu0 %vm48_vm1, %v29_v6  ;;  %266 = vmatprep.subr.bf16.mxu1 %v321_v1 }
   0xa   :  { %10 = vsyncpa [#allocation3], 0  ;;  %v292_v9 = vld [vmem:[%s413_s3 + $0x18] sm:$0xff]   ;;  %v293_v10 = vld [vmem:[%s413_s3 + $0x20] sm:$0xff]   ;;  %vm210_vm2 = vcmask 523264  }
   0xb   :  { %v294_v11 = vld [vmem:[%s413_s3 + $0x28] sm:$0xff]   ;;  %v295_v12 = vld [vmem:[%s413_s3 + $0x30] sm:$0xff]   ;;  %v296_v13 = vld [vmem:[%s413_s3 + $0x38] sm:$0xff]   ;;  %s323_s3 = smov [#allocation2]  }
   0xc   :  { %267 = vmatpush3.bf16.msra.mxu1 %v291_v8  ;;  %v229_v14 = vld [vmem:[%s412_s2] ss:$0 sm:$0xff]  ;;  %s218_s19 = sshll.u32 %s323_s3, 4  ;;  %s219_s19 = int_to_ptr.vmem [resolvable:$true] %s218_s19 }
   0xd   :  { %268 = vmatprep.subr.bf16.mxu1 %v321_v1  ;;  %v233_v24 = vld [vmem:[%s414_s4] ss:$0 sm:$0xff]  ;;  %s297_s2 = scalar_lea.vmem %s219_s19, 256  ;;  %p302_p1 = scmp.lt.s32.totalorder %s219_s19, %s219_s19 }
   0xe   :  { %p298_p0 = scmp.ne.s32.totalorder %s219_s19, %s297_s2  ;;  %p303_p2 = scmp.lt.s32.totalorder %s297_s2, %s297_s2 }
  0x10   :  { %269 = vmatpush3.bf16.msra.mxu1 %v292_v9  ;;  %p304_p3 = por %p303_p2, %p302_p1 }
  0x11   :  { %270 = vmatprep.subr.bf16.mxu1 %v321_v1 }
  0x12   :  { %p305_p4 = pnand %p304_p3, %p298_p0 }
  0x14   :  { %271 = vmatpush3.bf16.msra.mxu1 %v293_v10 }
  0x15   :  { %272 = vmatprep.subr.bf16.mxu1 %v321_v1 }
  0x18   :  { %273 = vmatpush3.bf16.msra.mxu1 %v294_v11 }
  0x19   :  { %274 = vmatprep.subr.bf16.mxu1 %v321_v1 }
  0x1c   :  { %275 = vmatpush3.bf16.msra.mxu1 %v295_v12 }
  0x1d   :  { %276 = vmatprep.subr.bf16.mxu1 %v321_v1 }
  0x20   :  { %277 = vmatpush3.bf16.msra.mxu1 %v296_v13 }
  0xdc   :  { %v86_v15 = vpop.f32.mrb[0].mxu0 }
  0xdd   :  { %v87_v16 = vadd.f32 %v229_v14, %v86_v15  ;;  %v260_v17 = vpop.f32.mrb[1].mxu0 }
  0xde   :  { %v89_v18 = vpop.f32.mrb[2].mxu0 }
  0xdf   :  { %v90_v19 = vadd.f32 %v229_v14, %v89_v18  ;;  %v261_v20 = vpop.f32.mrb[3].mxu0  ;;  %v93_v21 = vmax.f32 %v87_v16, 0.0 }
  0xe1   :  { %v94_v22 = vmax.f32 %v90_v19, 0.0 }
  0xe3   :  { %v112_v23 = vpack.c.bf16 %v94_v22, %v93_v21 }
  0xe5   :  { %279 = vmatmul.mubr.bf16.vlgmr.msra.gmra.mrb[0].mxu1 %v112_v23 }
 0x1b8   :  { %v201_v25 = vpop.f32.mrb[0].mxu1 }
 0x1b9   :  { %v202_v26 = vadd.f32 %v233_v24, %v201_v25  ;;  %v280_v27 = vpop.f32.mrb[1].mxu1 }
 0x1ba   :  { %v204_v28 = vpop.f32.mrb[2].mxu1 }
 0x1bb   :  { %v208_v29 = vmax.f32 %v202_v26, 0.0  ;;  %v205_v30 = vadd.f32 %v233_v24, %v204_v28  ;;  %v281_v31 = vpop.f32.mrb[3].mxu1 }
 0x1bd   :  { %211 = vst.msk [vmem:[#allocation2] sm:$0xff] %vm210_vm2, %v208_v29  ;;  %v209_v32 = vmax.f32 %v205_v30, 0.0 }
 0x1bf   :  { %212 = vst.msk [vmem:[#allocation2 + $0x8] sm:$0xff] %vm210_vm2, %v209_v32 }
 0x1c0   :  { %308 = shalt.err (!%p305_p4)
}
 0x1c1   :  { %s309_s21 = scalar_lea.hbm %s415_s5, 256 }
 0x1c2   :  { %p310_p5 = scmp.ne.s32.totalorder %s415_s5, %s309_s21  ;;  %p313_p6 = scmp.lt.u32.totalorder %s309_s21, %s415_s5 }
 0x1c4   :  { %p315_p7 = pnand %p313_p6, %p310_p5 }
 0x1c6   :  { %318 = shalt.err (!%p315_p7)
}
 0x1c7   :  { %s324_s26 = smov 128   ;;  %s325_s27 = smov 8  }
 0x1c8   :  { %224 = dma.vmem_to_hbm [thread:$0]  %s219_s19, 256, %s415_s5, [#allocation3], %s324_s26, %s324_s26, %s325_s27  }
 0x1c9   :  { %319 = dma.done.wait [#allocation3], 256  }
 0x1ca   :  { %320 = vsyncadd [#allocation3], 4294967040 }
 0x1cb   :  { %228 = vsyncpa [#allocation3], 1 }

</bundles_post_ra>
